<compile_context>
chip_gen: v7x
topology: tpu7x:2x2x1
jax: 0.10.0
libtpu: 0.0.40
codegen_flags: <defaults>
</compile_context>

<pallas_src>
import functools
from enum import Enum

import jax
import jax.numpy as jnp
from jax import lax
from jax.experimental import pallas as pl
from jax.experimental.pallas import tpu as pltpu


class Task(Enum):
    CATEGORY = 0
    COLOR = 1


# ----------------------------------------------------------------------------
# Fused per-batch kernel: conv(im2col matmul)+ReLU -> GAP(sublane reduce)
#                         -> FC+ReLU -> [identity | heads] matmul -> slab store
# ----------------------------------------------------------------------------
def _fused_forward_kernel(cols_ref, conv_w_ref, conv_b_ref, fc_w_ref, fc_b_ref,
                          head_w_ref, head_b_ref, out_ref, *, hw, chunk):
    conv_c = conv_w_ref.shape[1]
    n_chunks = hw // chunk

    def conv_reduce(tile):
        # Conv as im2col matmul (bf16 operands, f32 accumulation) + bias + ReLU,
        # then a per-chunk sublane reduce (XLU slot, not MXU) for the global avg pool.
        conv = jnp.dot(tile, conv_w_ref[...], preferred_element_type=jnp.float32)
        conv = jnp.maximum(conv + conv_b_ref[...], 0.0)          # (chunk, conv_c) f32
        return jnp.sum(conv, axis=0, keepdims=True)              # (1, conv_c) f32

    if n_chunks == 1:
        sums = conv_reduce(cols_ref[0])                          # whole batch in one pass
    else:
        # Chunk the lane-sparse (rows, conv_c) f32 intermediate to bound vreg pressure
        # while keeping the large per-batch DMA block.
        def body(i, acc):
            start = pl.multiple_of(i * chunk, chunk)
            return acc + conv_reduce(cols_ref[0, pl.ds(start, chunk), :])
        sums = lax.fori_loop(0, n_chunks, body,
                             jnp.zeros((1, conv_c), jnp.float32), unroll=True)

    pooled = sums * (1.0 / float(hw))                            # (1, conv_c) f32

    # Embedding FC + ReLU.
    emb = jnp.dot(pooled.astype(jnp.bfloat16), fc_w_ref[...],
                  preferred_element_type=jnp.float32)
    emb = jnp.maximum(emb + fc_b_ref[...], 0.0)                  # (1, emb_dim) f32

    # Heads: weight is [I_emb | head_w_cat | 0] so one matmul yields the lane-dense
    # [emb | all-head logits | zero pad] slab (no concatenate / masked stores).
    slab = jnp.dot(emb.astype(jnp.bfloat16), head_w_ref[...],
                   preferred_element_type=jnp.float32)
    slab = slab + head_b_ref[...]                                # (1, out_w) f32
    out_ref[...] = slab.reshape(out_ref.shape).astype(out_ref.dtype)


def fused_forward(cols, conv_w, conv_b, fc_w, fc_b, head_w_full, head_b_full, *, chunk):
    """One fused pallas_call for the whole forward pass, one grid step per batch.

    cols:        (B, HW, 9*C) bf16  im2col rows per batch image
    conv_w:      (9*C, conv_c) bf16 ; conv_b: (1, conv_c) f32
    fc_w:        (conv_c, emb_dim) bf16 ; fc_b: (1, emb_dim) f32
    head_w_full: (emb_dim, out_w) bf16   [I_emb | all heads | 0-pad]
    head_b_full: (1, out_w) f32          [0     | all biases| 0-pad]
    returns:     (B, out_w) f32 slab  [emb | all-head logits | zero pad]
    """
    B, HW, K9 = cols.shape
    conv_c = conv_w.shape[1]
    emb_dim = fc_w.shape[1]
    out_w = head_w_full.shape[1]
    assert HW % chunk == 0

    flops = 2 * B * (HW * K9 * conv_c + conv_c * emb_dim + emb_dim * out_w)
    bytes_accessed = (cols.size * 2 + conv_w.size * 2 + fc_w.size * 2
                      + head_w_full.size * 2
                      + (conv_b.size + fc_b.size + head_b_full.size) * 4
                      + B * out_w * 4)

    kernel = functools.partial(_fused_forward_kernel, hw=HW, chunk=chunk)
    slab = pl.pallas_call(
        kernel,
        out_shape=jax.ShapeDtypeStruct((B, 1, out_w), jnp.float32),
        grid=(B,),
        in_specs=[
            pl.BlockSpec((1, HW, K9), lambda b: (b, 0, 0)),          # one batch of im2col rows
            pl.BlockSpec((K9, conv_c), lambda b: (0, 0)),            # conv weight (resident)
            pl.BlockSpec((1, conv_c), lambda b: (0, 0)),             # conv bias
            pl.BlockSpec((conv_c, emb_dim), lambda b: (0, 0)),       # fc weight
            pl.BlockSpec((1, emb_dim), lambda b: (0, 0)),            # fc bias
            pl.BlockSpec((emb_dim, out_w), lambda b: (0, 0)),        # [I | heads | 0] weight
            pl.BlockSpec((1, out_w), lambda b: (0, 0)),              # [0 | head bias | 0]
        ],
        out_specs=pl.BlockSpec((1, 1, out_w), lambda b: (b, 0, 0)),  # per-batch lane-dense slab
        compiler_params=pltpu.CompilerParams(
            dimension_semantics=("parallel",),                       # batch axis -> v7x 2 TCs
            vmem_limit_bytes=32 * 1024 * 1024),                      # fits v7x 64 MiB physical
        cost_estimate=pl.CostEstimate(flops=flops, transcendentals=0,
                                      bytes_accessed=bytes_accessed),
    )(cols, conv_w, conv_b, fc_w, fc_b, head_w_full, head_b_full)
    return slab[:, 0, :]                                             # (B, out_w)


# ----------------------------------------------------------------------------
# Glue: im2col for a 3x3 / stride-1 / pad-1 conv (NHWC), built directly in bf16
# ----------------------------------------------------------------------------
# TODO(synk): for large B*H*W*C, move the 3x3 im2col fully into the kernel (9 shifted
# pl.ds loads / 9 accumulating K=C matmuls on a resident padded NHWC block) so the
# activation is read from HBM once instead of 9x-duplicated.
def im2col_3x3(x_nhwc):
    B, H, W, C = x_nhwc.shape
    xp = jnp.pad(x_nhwc, ((0, 0), (1, 1), (1, 1), (0, 0)))
    patches = [xp[:, dh:dh + H, dw:dw + W, :] for dh in range(3) for dw in range(3)]
    # K-axis ordering: (dh, dw) outer, input-channel inner -> weight layout [kh,kw,in_c,out_c]
    return jnp.concatenate(patches, axis=-1)  # (B, H, W, 9*C)


# ----------------------------------------------------------------------------
# MultiClassifierNet forward
# ----------------------------------------------------------------------------
def init_params(key, in_c=4, conv_c=16, emb_dim=32, head_dims=(10, 6)):
    ks = jax.random.split(key, 4 + 2 * len(head_dims))
    params = {
        # conv weight stored pre-flattened for im2col matmul: [(3*3*in_c), conv_c]
        "conv_w": (jax.random.normal(ks[0], (3, 3, in_c, conv_c), jnp.float32) * 0.1
                   ).reshape(9 * in_c, conv_c),
        "conv_b": jax.random.normal(ks[1], (conv_c,), jnp.float32) * 0.1,
        "fc_w": jax.random.normal(ks[2], (conv_c, emb_dim), jnp.float32) * 0.1,
        "fc_b": jax.random.normal(ks[3], (emb_dim,), jnp.float32) * 0.1,
        "head_w": [],
        "head_b": [],
    }
    for i, n_cls in enumerate(head_dims):
        params["head_w"].append(
            jax.random.normal(ks[4 + 2 * i], (emb_dim, n_cls), jnp.float32) * 0.1)
        params["head_b"].append(
            jax.random.normal(ks[5 + 2 * i], (n_cls,), jnp.float32) * 0.1)
    return params


def multi_classifier_forward(params, x_nchw, tasks=(), output_embeddings=False):
    """Mirrors MultiClassifierNet.forward: emb = base(x); out = [tops[t.value](emb) for t in tasks]."""
    # layout: input is NCHW (PyTorch convention); kernel runs on NHWC / [rows, features].
    x = jnp.transpose(x_nchw, (0, 2, 3, 1)).astype(jnp.bfloat16)  # bf16 before im2col: one bf16 HBM array
    B, H, W, C = x.shape
    HW = H * W

    cols = im2col_3x3(x).reshape(B, HW, 9 * C)                    # (B, HW, 9C) bf16

    emb_dim = params["fc_w"].shape[1]
    head_dims = [w.shape[1] for w in params["head_w"]]
    head_w_cat = jnp.concatenate(params["head_w"], axis=1)        # (emb_dim, sum(heads))
    head_b_cat = jnp.concatenate(params["head_b"], axis=0)
    n_heads_tot = head_w_cat.shape[1]

    # Augmented head matrix: [I_emb | heads | 0-pad] -> kernel emits [emb | logits | 0]
    # as a single lane-dense (1, 128k)-wide matmul + store (no in-kernel concatenate).
    out_w = 128 * pl.cdiv(emb_dim + n_heads_tot, 128)
    head_w_full = jnp.zeros((emb_dim, out_w), jnp.float32)
    head_w_full = head_w_full.at[:, :emb_dim].set(jnp.eye(emb_dim, dtype=jnp.float32))
    head_w_full = head_w_full.at[:, emb_dim:emb_dim + n_heads_tot].set(head_w_cat)
    head_b_full = jnp.zeros((out_w,), jnp.float32)
    head_b_full = head_b_full.at[emb_dim:emb_dim + n_heads_tot].set(head_b_cat)

    # In-kernel conv/reduce chunk: largest divisor of HW that is <= 256 rows.
    chunk = HW
    for c in range(min(HW, 256), 0, -1):
        if HW % c == 0:
            chunk = c
            break

    slab = fused_forward(
        cols,
        params["conv_w"].astype(jnp.bfloat16), params["conv_b"].reshape(1, -1),
        params["fc_w"].astype(jnp.bfloat16), params["fc_b"].reshape(1, -1),
        head_w_full.astype(jnp.bfloat16), head_b_full.reshape(1, -1),
        chunk=chunk)                                              # (B, out_w)

    emb = slab[:, :emb_dim]
    offsets = [0]
    for d in head_dims:
        offsets.append(offsets[-1] + d)
    out = [slab[:, emb_dim + offsets[t.value]: emb_dim + offsets[t.value] + head_dims[t.value]]
           for t in tasks]
    if output_embeddings:
        return [emb] + out
    return out


# ----------------------------------------------------------------------------
# Pure-JAX reference (for a tolerance check; bf16 MXU operands -> loose tolerances)
# ----------------------------------------------------------------------------
def reference_forward(params, x_nchw, tasks=(), output_embeddings=False):
    x = jnp.transpose(x_nchw, (0, 2, 3, 1)).astype(jnp.float32)
    B, H, W, C = x.shape
    cols = im2col_3x3(x).reshape(B * H * W, 9 * C)
    conv = jnp.maximum(cols @ params["conv_w"] + params["conv_b"], 0.0)
    pooled = conv.reshape(B, H * W, -1).mean(axis=1)
    emb = jnp.maximum(pooled @ params["fc_w"] + params["fc_b"], 0.0)
    out = [emb @ params["head_w"][t.value] + params["head_b"][t.value] for t in tasks]
    return ([emb] + out) if output_embeddings else out


if __name__ == "__main__":
    key = jax.random.PRNGKey(0)
    k_param, k_x = jax.random.split(key)

    params = init_params(k_param, in_c=4, conv_c=16, emb_dim=32, head_dims=(10, 6))
    x = jax.random.normal(k_x, (2, 4, 16, 16), jnp.float32)  # NCHW, like the PyTorch module

    tasks = [Task.CATEGORY, Task.COLOR]
    outs = multi_classifier_forward(params, x, tasks=tasks, output_embeddings=True)
    outs = [jax.block_until_ready(o) for o in outs]

    emb, cat_logits, col_logits = outs
    assert emb.shape == (2, 32)
    assert cat_logits.shape == (2, 10)
    assert col_logits.shape == (2, 6)

    refs = reference_forward(params, x, tasks=tasks, output_embeddings=True)
    for got, want in zip(outs, refs):
        assert jnp.allclose(got, want, rtol=5e-2, atol=5e-2), (got, want)

    print("KERNEL_OK")
</pallas_src>

<mosaic_0001>
module attributes {stable_mosaic.version = 11 : i64} {
  func.func @_fused_forward_kernel(%arg0: i32, %arg1: memref<1x256x36xbf16, #tpu.memory_space<vmem>>, %arg2: memref<36x16xbf16, #tpu.memory_space<vmem>>, %arg3: memref<1x16xf32, #tpu.memory_space<vmem>>, %arg4: memref<16x32xbf16, #tpu.memory_space<vmem>>, %arg5: memref<1x32xf32, #tpu.memory_space<vmem>>, %arg6: memref<32x128xbf16, #tpu.memory_space<vmem>>, %arg7: memref<1x128xf32, #tpu.memory_space<vmem>>, %arg8: memref<1x1x128xf32, #tpu.memory_space<vmem>>) attributes {dimension_semantics = [#tpu.dimension_semantics<parallel>], iteration_bounds = array<i64: 2>, scalar_prefetch = 0 : i64, scratch_operands = 0 : i64, tpu.core_type = #tpu.core_type<tc>, window_params = [{transform_indices = @transform_0, window_bounds = array<i64: 1, 256, 36>}, {pipeline_mode = #tpu.pipeline_mode<synchronous>, transform_indices = @transform_1, window_bounds = array<i64: 36, 16>}, {pipeline_mode = #tpu.pipeline_mode<synchronous>, transform_indices = @transform_2, window_bounds = array<i64: 1, 16>}, {pipeline_mode = #tpu.pipeline_mode<synchronous>, transform_indices = @transform_3, window_bounds = array<i64: 16, 32>}, {pipeline_mode = #tpu.pipeline_mode<synchronous>, transform_indices = @transform_4, window_bounds = array<i64: 1, 32>}, {pipeline_mode = #tpu.pipeline_mode<synchronous>, transform_indices = @transform_5, window_bounds = array<i64: 32, 128>}, {pipeline_mode = #tpu.pipeline_mode<synchronous>, transform_indices = @transform_6, window_bounds = array<i64: 1, 128>}, {transform_indices = @transform_7, window_bounds = array<i64: 1, 1, 128>}]} {
    %c0 = arith.constant 0 : index
    %c0_0 = arith.constant 0 : index
    %c0_1 = arith.constant 0 : index
    %0 = vector.load %arg1[%c0, %c0_0, %c0_1] : memref<1x256x36xbf16, #tpu.memory_space<vmem>>, vector<1x256x36xbf16>
    %1 = vector.shape_cast %0 : vector<1x256x36xbf16> to vector<256x36xbf16>
    %c0_2 = arith.constant 0 : index
    %c0_3 = arith.constant 0 : index
    %2 = vector.load %arg2[%c0_2, %c0_3] : memref<36x16xbf16, #tpu.memory_space<vmem>>, vector<36x16xbf16>
    %cst = arith.constant dense<0.000000e+00> : vector<256x16xf32>
    %3 = tpu.matmul %1, %2, %cst {dimension_numbers = #tpu.dot_dimension_numbers<[1], [0], [0], [1], [0, 0, 1, 1], [], []>} : vector<256x36xbf16>, vector<36x16xbf16>, vector<256x16xf32> -> vector<256x16xf32>
    %c0_4 = arith.constant 0 : index
    %c0_5 = arith.constant 0 : index
    %4 = vector.load %arg3[%c0_4, %c0_5] : memref<1x16xf32, #tpu.memory_space<vmem>>, vector<1x16xf32>
    %5 = vector.broadcast %4 : vector<1x16xf32> to vector<256x16xf32>
    %6 = arith.addf %3, %5 : vector<256x16xf32>
    %cst_6 = arith.constant 0.000000e+00 : f32
    %7 = vector.broadcast %cst_6 : f32 to vector<256x16xf32>
    %8 = arith.maximumf %6, %7 : vector<256x16xf32>
    %cst_7 = arith.constant dense<0.000000e+00> : vector<16xf32>
    %9 = vector.multi_reduction <add>, %8, %cst_7 [0] : vector<256x16xf32> to vector<16xf32>
    %10 = vector.shape_cast %9 : vector<16xf32> to vector<1x16xf32>
    %cst_8 = arith.constant 3.906250e-03 : f32
    %11 = vector.broadcast %cst_8 : f32 to vector<1x16xf32>
    %12 = arith.mulf %10, %11 : vector<1x16xf32>
    %13 = arith.truncf %12 : vector<1x16xf32> to vector<1x16xbf16>
    %c0_9 = arith.constant 0 : index
    %c0_10 = arith.constant 0 : index
    %14 = vector.load %arg4[%c0_9, %c0_10] : memref<16x32xbf16, #tpu.memory_space<vmem>>, vector<16x32xbf16>
    %cst_11 = arith.constant dense<0.000000e+00> : vector<1x32xf32>
    %15 = tpu.matmul %13, %14, %cst_11 {dimension_numbers = #tpu.dot_dimension_numbers<[1], [0], [0], [1], [0, 0, 1, 1], [], []>} : vector<1x16xbf16>, vector<16x32xbf16>, vector<1x32xf32> -> vector<1x32xf32>
    %c0_12 = arith.constant 0 : index
    %c0_13 = arith.constant 0 : index
    %16 = vector.load %arg5[%c0_12, %c0_13] : memref<1x32xf32, #tpu.memory_space<vmem>>, vector<1x32xf32>
    %17 = arith.addf %15, %16 : vector<1x32xf32>
    %cst_14 = arith.constant 0.000000e+00 : f32
    %18 = vector.broadcast %cst_14 : f32 to vector<1x32xf32>
    %19 = arith.maximumf %17, %18 : vector<1x32xf32>
    %20 = arith.truncf %19 : vector<1x32xf32> to vector<1x32xbf16>
    %c0_15 = arith.constant 0 : index
    %c0_16 = arith.constant 0 : index
    %21 = vector.load %arg6[%c0_15, %c0_16] : memref<32x128xbf16, #tpu.memory_space<vmem>>, vector<32x128xbf16>
    %cst_17 = arith.constant dense<0.000000e+00> : vector<1x128xf32>
    %22 = tpu.matmul %20, %21, %cst_17 {dimension_numbers = #tpu.dot_dimension_numbers<[1], [0], [0], [1], [0, 0, 1, 1], [], []>} : vector<1x32xbf16>, vector<32x128xbf16>, vector<1x128xf32> -> vector<1x128xf32>
    %c0_18 = arith.constant 0 : index
    %c0_19 = arith.constant 0 : index
    %23 = vector.load %arg7[%c0_18, %c0_19] : memref<1x128xf32, #tpu.memory_space<vmem>>, vector<1x128xf32>
    %24 = arith.addf %22, %23 : vector<1x128xf32>
    %25 = vector.shape_cast %24 : vector<1x128xf32> to vector<1x1x128xf32>
    %c0_20 = arith.constant 0 : index
    %c0_21 = arith.constant 0 : index
    %c0_22 = arith.constant 0 : index
    %26 = vector.load %arg8[%c0_20, %c0_21, %c0_22] : memref<1x1x128xf32, #tpu.memory_space<vmem>>, vector<1x1x128xf32>
    tpu.vector_store %arg8[%c0_20, %c0_21, %c0_22], %25 {strides = array<i32>} : memref<1x1x128xf32, #tpu.memory_space<vmem>>, vector<1x1x128xf32>,
    return
  }
  func.func @transform_0(%arg0: i32) -> (i32, i32, i32) {
    %c0_i32 = arith.constant 0 : i32
    %c0_i32_0 = arith.constant 0 : i32
    %c0_i32_1 = arith.constant 0 : i32
    return %arg0, %c0_i32, %c0_i32_0 : i32, i32, i32
  }
  func.func @transform_1(%arg0: i32) -> (i32, i32) {
    %c0_i32 = arith.constant 0 : i32
    %c0_i32_0 = arith.constant 0 : i32
    %c0_i32_1 = arith.constant 0 : i32
    return %c0_i32, %c0_i32_0 : i32, i32
  }
  func.func @transform_2(%arg0: i32) -> (i32, i32) {
    %c0_i32 = arith.constant 0 : i32
    %c0_i32_0 = arith.constant 0 : i32
    %c0_i32_1 = arith.constant 0 : i32
    return %c0_i32, %c0_i32_0 : i32, i32
  }
  func.func @transform_3(%arg0: i32) -> (i32, i32) {
    %c0_i32 = arith.constant 0 : i32
    %c0_i32_0 = arith.constant 0 : i32
    %c0_i32_1 = arith.constant 0 : i32
    return %c0_i32, %c0_i32_0 : i32, i32
  }
  func.func @transform_4(%arg0: i32) -> (i32, i32) {
    %c0_i32 = arith.constant 0 : i32
    %c0_i32_0 = arith.constant 0 : i32
    %c0_i32_1 = arith.constant 0 : i32
    return %c0_i32, %c0_i32_0 : i32, i32
  }
  func.func @transform_5(%arg0: i32) -> (i32, i32) {
    %c0_i32 = arith.constant 0 : i32
    %c0_i32_0 = arith.constant 0 : i32
    %c0_i32_1 = arith.constant 0 : i32
    return %c0_i32, %c0_i32_0 : i32, i32
  }
  func.func @transform_6(%arg0: i32) -> (i32, i32) {
    %c0_i32 = arith.constant 0 : i32
    %c0_i32_0 = arith.constant 0 : i32
    %c0_i32_1 = arith.constant 0 : i32
    return %c0_i32, %c0_i32_0 : i32, i32
  }
  func.func @transform_7(%arg0: i32) -> (i32, i32, i32) {
    %c0_i32 = arith.constant 0 : i32
    %c0_i32_0 = arith.constant 0 : i32
    %c0_i32_1 = arith.constant 0 : i32
    return %arg0, %c0_i32, %c0_i32_0 : i32, i32, i32
  }
}

</mosaic_0001>

<bundles_post_ra>
// kernel: tpu_custom_call.1
= control target key start
LH: loop header
LB: loop body
LE: loop exit
PB: predicated region body
PF: predicated region fallthrough
CT: control target
= control target key end

     0   :  { %12 = vsyncpa [#allocation3], 0  ;;  %s1494_s0 = inlined_call_operand.vmem [shape: bf16[2,256,36], index: 0, kind: input, shape index: {}]   ;;  %s1495_s1 = inlined_call_operand.vmem [shape: bf16[36,16], index: 1, kind: input, shape index: {}]   ;;  %s1496_s2 = inlined_call_operand.vmem [shape: f32[1,16], index: 2, kind: input, shape index: {}]   ;;  %s1497_s3 = inlined_call_operand.vmem [shape: bf16[16,32], index: 3, kind: input, shape index: {}]   ;;  %s1498_s4 = inlined_call_operand.vmem [shape: f32[1,32], index: 4, kind: input, shape index: {}]   ;;  %s1499_s5 = inlined_call_operand.vmem [shape: bf16[32,128], index: 5, kind: input, shape index: {}]   ;;  %s1500_s6 = inlined_call_operand.vmem [shape: f32[1,128], index: 6, kind: input, shape index: {}]   ;;  %s1501_s7 = inlined_call_operand.hbm [shape: f32[2,1,128], index: 7, kind: output, shape index: {}]  }
   0x1   :  { %14 = vsyncpa [#allocation3 + $0x1], 0  ;;  %s1223_s24 = smov 0   ;;  %s1225_s25 = smov 0  }
   0x2   :  { %s1227_s26 = smov 0   ;;  %s1229_s27 = smov 0  }
   0x3 LB: > { %s1244_s28 = sadd.s32 4294967295, %s1178_s27   ;;  %s918_s29 = sadd.s32 4294967294, %s1178_s27   ;;  %s1178_s27 = sphi %s1229_s27, %s1507_s27   ;;  %s1174_s26 = sphi %s1227_s26, %s1506_s26   ;;  %s1170_s25 = sphi %s1225_s25, %s1505_s25   ;;  %s1166_s24 = sphi %s1223_s24, %s1504_s24  }
   0x4   : > { %s1248_s30 = sadd.s32 1, %s1178_s27   ;;  %s179_s8 = sadd.s32 1, %s1174_s26 }
   0x5   : > { %s176_s9 = ssub.s32 %s1178_s27, %s1248_s30  ;;  %p189_p0 = scmp.ne.s32.totalorder %s1174_s26, %s1170_s25 }
   0x6   : > { %p177_p1 = scmp.eq.s32.totalorder %s176_s9, 0  ;;  %p190_p2 = scmp.eq.s32.totalorder %s1244_s28, 1 }
   0x7   : > { %p195_p3 = scmp.ne.s32.totalorder %s1170_s25, %s1166_s24  ;;  %p196_p4 = scmp.eq.s32.totalorder %s918_s29, 1 }
   0x8   : > { %s1259_s10 = scalar_select %p177_p1, %s1174_s26, %s179_s8  }
   0x9   : > { %p1261_p5 = por %p190_p2, %p189_p0  ;;  %p1265_p6 = por %p196_p4, %p195_p3 }
   0xa   : > { %p921_p7 = scmp.ge.s32.totalorder %s1178_s27, 1  ;;  %p240_p8 = scmp.lt.s32.totalorder %s1178_s27, 3 }
   0xc   : > { %p241_p9 = pnand %p921_p7, %p240_p8 }
   0xd   : > { %v1094_v0 = vld [vmem:[%s1495_s1] sm:$0xff] (!%p241_p9)   ;;  %v1095_v1 = vld [vmem:[%s1495_s1 + $0x8] sm:$0xff] (!%p241_p9)   ;;  %p271_p10 = scmp.lt.s32.totalorder (!%p241_p9), %s1244_s28, 1  ;;  %v1096_v2 = vld [vmem:[%s1495_s1 + $0x10] ss:$0 sps:$4 sm:$0x33] (!%p241_p9)  }
   0xe   : > { %244 = sbr.rel (%p241_p9) target bundleno = 771 (0x303), region = 48  ;;  %993 = vmatprep.subr.bf16.mxu0 (!%p241_p9), %v1094_v0  ;;  %1045 = vmatprep.subr.bf16.mxu1 (!%p241_p9), %v1094_v0  ;;  %vm465_vm0 = vcmask (!%p241_p9), 1041408   ;;  %vm416_vm1 = vcmask (!%p241_p9), 293888   ;;  %v1113_v20 = vld [vmem:[%s1497_s3] sm:$0xff] (!%p241_p9)   ;;  %v1180_v21 = vmov (!%p241_p9), 0.0   ;;  %vm1181_vm2 = vmmov (!%p241_p9), 0  }
   0xf   : > { %994 = vmatpush3.bf16.msra.mxu0 (!%p241_p9), %v1094_v0  ;;  %1048 = vmatpush3.bf16.msra.mxu1 (!%p241_p9), %v1094_v0  ;;  %v467_v4 = vsel (!%p241_p9), %vm465_vm0, %v1096_v2, 0  ;;  %v1329_v22 = vld [vmem:[%s1496_s2] ss:$0 sm:$0xff] (!%p241_p9)  ;;  %vm662_vm3 = vcmask (!%p241_p9), 130048   ;;  %vm805_vm4 = vcmask (!%p241_p9), 261120   ;;  %s1182_s16 = smov (!%p241_p9), [#allocation2]  }
  0x10   : > { %995 = vmatprep.subr.bf16.mxu0 (!%p241_p9), %v1095_v1  ;;  %1046 = vmatprep.subr.bf16.mxu1 (!%p241_p9), %v1095_v1  ;;  %s1120_s17 = sshll.u32 (!%p241_p9), %s1182_s16, 4  ;;  %s1121_s17 = int_to_ptr.vmem [resolvable:$false] %s1120_s17 }
  0x11   : > { %s1122_s18 = scalar_lea.vmem (!%p241_p9), %s1121_s17, 32 }
  0x13   : > { %996 = vmatpush3.bf16.msra.mxu0 (!%p241_p9), %v1095_v1  ;;  %1049 = vmatpush3.bf16.msra.mxu1 (!%p241_p9), %v1095_v1 }
  0x14   : > { %1051 = vmatprep.subr.msk.bf16.mxu0 (!%p241_p9), %vm465_vm0, %v1096_v2  ;;  %1052 = vmatprep.subr.msk.bf16.mxu1 (!%p241_p9), %vm465_vm0, %v1096_v2 }
  0x15   : > { %s272_s19 = scalar_select %p271_p10, %s1244_s28, 1 }
  0x17   : > { %s968_s20 = sshll.u32 %s272_s19, 7  ;;  %998 = vmatpush3.bf16.msra.mxu0 %v467_v4  ;;  %1050 = vmatpush3.bf16.msra.mxu1 %v467_v4 }
  0x18   : > { %s1285_s23 = scalar_lea.vmem %s1494_s0, %s968_s20  ;;  %1031 = vmatprep.subr.bf16.mxu1 %v1180_v21  ;;  %s269_s20 = sand.u32 1, %s1170_s25  }
  0x19   : > { %v1097_v3 = vld [vmem:[%s1285_s23] sm:$0xff]   ;;  %v1098_v5 = vld [vmem:[%s1285_s23 + $0x8] sm:$0xff]   ;;  %v1099_v6 = vld [vmem:[%s1285_s23 + $0x10] sm:$0xff]   ;;  %s270_s29 = scalar_lea.vmem [#allocation2], %s269_s20  ;;  %s851_s15 = scalar_lea.sflag [#allocation3], %s269_s20 }
  0x1a   : > { %999 = vmatprep.mubr.msk.bf16.mxu0 %vm416_vm1, %v1097_v3  ;;  %v1100_v7 = vld [vmem:[%s1285_s23 + $0x18] sm:$0xff]   ;;  %v1101_v8 = vld [vmem:[%s1285_s23 + $0x20] sm:$0xff]   ;;  %v1107_v9 = vld [vmem:[%s1285_s23 + $0x50] sm:$0xff]   ;;  %s863_s8 = sshll.u32 %s270_s29, 4  ;;  %s1454_s8 = int_to_ptr.vmem [resolvable:$true] %s863_s8 }
  0x1b   : > { %1000 = vmatmul.mubr.msk.bf16.vlgmr.msra.gmra.mrb[0].mxu0 %vm416_vm1, %v1098_v5  ;;  %v1108_v10 = vld [vmem:[%s1285_s23 + $0x58] sm:$0xff]   ;;  %1019 = vmatprep.mubr.msk.bf16.mxu1 %vm416_vm1, %v1107_v9  ;;  %v1109_v11 = vld [vmem:[%s1285_s23 + $0x60] sm:$0xff]   ;;  %v1110_v12 = vld [vmem:[%s1285_s23 + $0x68] sm:$0xff]   ;;  %p1123_p0 = scmp.lt.s32.totalorder %s1454_s8, %s1121_s17 }
  0x1c   : > { %1003 = vmatprep.mubr.msk.bf16.mxu0 %vm416_vm1, %v1099_v6  ;;  %1020 = vmatmul.mubr.msk.bf16.vlgmr.msra.gmra.mrb[0].mxu1 %vm416_vm1, %v1108_v10  ;;  %v1111_v13 = vld [vmem:[%s1285_s23 + $0x70] sm:$0xff]   ;;  %v1102_v14 = vld [vmem:[%s1285_s23 + $0x28] sm:$0xff]   ;;  %v1112_v16 = vld [vmem:[%s1285_s23 + $0x78] sm:$0xff]  }
  0x1d   : > { %1023 = vmatprep.mubr.msk.bf16.mxu1 %vm416_vm1, %v1109_v11  ;;  %v1103_v15 = vld [vmem:[%s1285_s23 + $0x30] sm:$0xff]   ;;  %v1104_v17 = vld [vmem:[%s1285_s23 + $0x38] sm:$0xff]   ;;  %v1105_v18 = vld [vmem:[%s1285_s23 + $0x40] sm:$0xff]   ;;  %1032 = vmatpush3.bf16.msra.mxu1 %v1113_v20 }
  0x1e   : > { %v1106_v19 = vld [vmem:[%s1285_s23 + $0x48] sm:$0xff]   ;;  %1037 = vmatprep.subr.bf16.mxu1 %v1180_v21  ;;  %s965_s23 = sshll.u32 %s1244_s28, 4  ;;  %s1116_s28 = scalar_lea.vmem %s1454_s8, 16 }
  0x1f   : > { %s1452_s14 = scalar_lea.hbm %s1501_s7, %s965_s23  ;;  %p1117_p11 = scmp.ne.s32.totalorder %s1454_s8, %s1116_s28 }
  0x20   : > { %p1124_p1 = scmp.lt.s32.totalorder %s1122_s18, %s1116_s28 }
  0x21   : > { %p1118_p12 = pnand %p1117_p11, %p1261_p5 }
  0x22   : > { %p1125_p2 = por %p1124_p1, %p1123_p0 }
  0x23   : > { %1004 = vmatmul.mubr.msk.bf16.gmra.mrb[4].mxu0 %vm416_vm1, %v1100_v7  ;;  %p1119_p13 = pneg %p1118_p12 }
  0x24   : > { %1007 = vmatprep.mubr.msk.bf16.mxu0 %vm416_vm1, %v1101_v8  ;;  %1024 = vmatmul.mubr.msk.bf16.gmra.mrb[4].mxu1 %vm416_vm1, %v1110_v12 }
  0x25   : > { %1027 = vmatprep.mubr.msk.bf16.mxu1 %vm416_vm1, %v1111_v13  ;;  %p1126_p3 = pnand %p1125_p2, %p1119_p13 }
  0x2b   : > { %1008 = vmatmul.mubr.msk.bf16.gmra.mrb[8].mxu0 %vm416_vm1, %v1102_v14 }
  0x2c   : > { %1011 = vmatprep.mubr.msk.bf16.mxu0 %vm416_vm1, %v1103_v15  ;;  %1028 = vmatmul.mubr.msk.bf16.gmra.mrb[8].mxu1 %vm416_vm1, %v1112_v16 }
  0x2d   : > { %1033 = vmatprep.mubr.msk.bf16.mxu1 %vm1181_vm2, %v1180_v21 }
  0x33   : > { %1012 = vmatmul.mubr.msk.bf16.gmra.mrb[12].mxu0 %vm416_vm1, %v1104_v17 }
  0x34   : > { %1015 = vmatprep.mubr.msk.bf16.mxu0 %vm416_vm1, %v1105_v18 }
  0x3b   : > { %1016 = vmatmul.mubr.msk.bf16.gmra.mrb[16].mxu0 %vm416_vm1, %v1106_v19 }
  0xee   : > { %v1001_v23 = vpop.f32.mrb[0].mxu0 }
  0xef   : > { %v503_v24 = vpop.f32.mrb[1].mxu0  ;;  %v512_v25 = vadd.f32 %v1001_v23, %v1329_v22  ;;  %v1335_v34 = vpop.f32.mrb[0].mxu1 }
  0xf0   : > { %v504_v26 = vadd.f32 %v1329_v22, %v503_v24  ;;  %v1002_v27 = vpop.f32.mrb[2].mxu0  ;;  %v1337_v35 = vpop.f32.mrb[1].mxu1 }
  0xf1   : > { %v506_v28 = vpop.f32.mrb[3].mxu0  ;;  %v515_v30 = vadd.f32 %v1002_v27, %v1329_v22  ;;  %v632_v32 = vmax.f32 %v512_v25, 0.0  ;;  %v1341_v40 = vpop.f32.mrb[2].mxu1 }
  0xf2   : > { %v630_v29 = vmax.f32 %v504_v26, 0.0  ;;  %v507_v31 = vadd.f32 %v1329_v22, %v506_v28  ;;  %v1343_v43 = vpop.f32.mrb[3].mxu1 }
  0xf3   : > { %v633_v37 = vmax.f32 %v515_v30, 0.0  ;;  %v666_v44 = vsel %vm662_vm3, %v632_v32, 0.0 }
  0xf4   : > { %v631_v33 = vmax.f32 %v507_v31, 0.0  ;;  %v663_v36 = vsel %vm662_vm3, %v630_v29, 0.0 }
  0xf5   : > { %v668_v50 = vsel %vm662_vm3, %v633_v37, 0.0 }
  0xf6   : > { %v664_v38 = vsel %vm662_vm3, %v631_v33, 0.0  ;;  %v1005_v39 = vpop.f32.mrb[4].mxu0 }
  0xf7   : > { %v665_v41 = vadd.f32 %v664_v38, %v663_v36  ;;  %v519_v42 = vpop.f32.mrb[5].mxu0  ;;  %v528_v45 = vadd.f32 %v1005_v39, %v1329_v22  ;;  %v1352_v58 = vpop.f32.mrb[4].mxu1 }
  0xf8   : > { %v520_v46 = vadd.f32 %v1329_v22, %v519_v42  ;;  %v1006_v47 = vpop.f32.mrb[6].mxu0  ;;  %v1354_v60 = vpop.f32.mrb[5].mxu1 }
  0xf9   : > { %v667_v48 = vadd.f32 %v666_v44, %v665_v41  ;;  %v522_v49 = vpop.f32.mrb[7].mxu0  ;;  %v531_v52 = vadd.f32 %v1006_v47, %v1329_v22  ;;  %v636_v55 = vmax.f32 %v528_v45, 0.0  ;;  %v1357_v0 = vpop.f32.mrb[6].mxu1 }
  0xfa   : > { %v634_v51 = vmax.f32 %v520_v46, 0.0  ;;  %v523_v53 = vadd.f32 %v1329_v22, %v522_v49  ;;  %v1359_v3 = vpop.f32.mrb[7].mxu1 }
  0xfb   : > { %v669_v54 = vadd.f32 %v668_v50, %v667_v48  ;;  %v637_v61 = vmax.f32 %v531_v52, 0.0  ;;  %v674_v4 = vsel %vm662_vm3, %v636_v55, 0.0 }
  0xfc   : > { %v670_v56 = vsel %vm662_vm3, %v634_v51, 0.0  ;;  %v635_v57 = vmax.f32 %v523_v53, 0.0 }
  0xfd   : > { %v671_v59 = vadd.f32 %v670_v56, %v669_v54  ;;  %v676_v10 = vsel %vm662_vm3, %v637_v61, 0.0 }
  0xfe   : > { %v672_v62 = vsel %vm662_vm3, %v635_v57, 0.0  ;;  %v1009_v63 = vpop.f32.mrb[8].mxu0 }
  0xff   : > { %v673_v1 = vadd.f32 %v672_v62, %v671_v59  ;;  %v535_v2 = vpop.f32.mrb[9].mxu0  ;;  %v544_v5 = vadd.f32 %v1009_v63, %v1329_v22  ;;  %v1368_v18 = vpop.f32.mrb[8].mxu1  ;;  %v584_v62 = vadd.f32 %v1329_v22, %v1337_v35  ;;  %v587_v35 = vadd.f32 %v1329_v22, %v1343_v43 }
 0x100   : > { %v536_v6 = vadd.f32 %v1329_v22, %v535_v2  ;;  %v1010_v7 = vpop.f32.mrb[10].mxu0  ;;  %v1370_v20 = vpop.f32.mrb[9].mxu1 }
 0x101   : > { %v675_v8 = vadd.f32 %v674_v4, %v673_v1  ;;  %v538_v9 = vpop.f32.mrb[11].mxu0  ;;  %v547_v12 = vadd.f32 %v1010_v7, %v1329_v22  ;;  %v640_v15 = vmax.f32 %v544_v5, 0.0  ;;  %v1373_v26 = vpop.f32.mrb[10].mxu1 }
 0x102   : > { %v638_v11 = vmax.f32 %v536_v6, 0.0  ;;  %v539_v13 = vadd.f32 %v1329_v22, %v538_v9  ;;  %v1375_v29 = vpop.f32.mrb[11].mxu1 }
 0x103   : > { %v677_v14 = vadd.f32 %v676_v10, %v675_v8  ;;  %v641_v23 = vmax.f32 %v547_v12, 0.0  ;;  %v682_v30 = vsel %vm662_vm3, %v640_v15, 0.0  ;;  %v650_v12 = vmax.f32 %v584_v62, 0.0 }
 0x104   : > { %v678_v16 = vsel %vm662_vm3, %v638_v11, 0.0  ;;  %v639_v17 = vmax.f32 %v539_v13, 0.0  ;;  %v592_v15 = vadd.f32 %v1335_v34, %v1329_v22  ;;  %v603_v34 = vadd.f32 %v1329_v22, %v1359_v3 }
 0x105   : > { %v679_v19 = vadd.f32 %v678_v16, %v677_v14  ;;  %v684_v38 = vsel %vm662_vm3, %v641_v23, 0.0  ;;  %v702_v23 = vsel %vm662_vm3, %v650_v12, 0.0 }
 0x106   : > { %v680_v24 = vsel %vm662_vm3, %v639_v17, 0.0  ;;  %v1013_v25 = vpop.f32.mrb[12].mxu0  ;;  %v595_v17 = vadd.f32 %v1341_v40, %v1329_v22  ;;  %v652_v43 = vmax.f32 %v592_v15, 0.0 }
 0x107   : > { %v681_v27 = vadd.f32 %v680_v24, %v679_v19  ;;  %v551_v28 = vpop.f32.mrb[13].mxu0  ;;  %v560_v31 = vadd.f32 %v1013_v25, %v1329_v22  ;;  %v651_v24 = vmax.f32 %v587_v35, 0.0  ;;  %v600_v25 = vadd.f32 %v1329_v22, %v1354_v60 }
 0x108   : > { %v552_v32 = vadd.f32 %v1329_v22, %v551_v28  ;;  %v1014_v33 = vpop.f32.mrb[14].mxu0  ;;  %v706_v40 = vsel %vm662_vm3, %v652_v43, 0.0 }
 0x109   : > { %v683_v36 = vadd.f32 %v682_v30, %v681_v27  ;;  %v554_v37 = vpop.f32.mrb[15].mxu0  ;;  %v563_v41 = vadd.f32 %v1014_v33, %v1329_v22  ;;  %v644_v45 = vmax.f32 %v560_v31, 0.0  ;;  %v653_v30 = vmax.f32 %v595_v17, 0.0 }
 0x10a   : > { %v642_v39 = vmax.f32 %v552_v32, 0.0  ;;  %v555_v42 = vadd.f32 %v1329_v22, %v554_v37  ;;  %v704_v31 = vsel %vm662_vm3, %v651_v24, 0.0  ;;  %v654_v32 = vmax.f32 %v600_v25, 0.0 }
 0x10b   : > { %v685_v44 = vadd.f32 %v684_v38, %v683_v36  ;;  %v645_v49 = vmax.f32 %v563_v41, 0.0  ;;  %v690_v54 = vsel %vm662_vm3, %v644_v45, 0.0  ;;  %v608_v36 = vadd.f32 %v1352_v58, %v1329_v22 }
 0x10c   : > { %v686_v46 = vsel %vm662_vm3, %v642_v39, 0.0  ;;  %v643_v47 = vmax.f32 %v555_v42, 0.0  ;;  %v708_v37 = vsel %vm662_vm3, %v653_v30, 0.0  ;;  %v710_v60 = vsel %vm662_vm3, %v654_v32, 0.0 }
 0x10d   : > { %v687_v48 = vadd.f32 %v686_v46, %v685_v44  ;;  %v692_v63 = vsel %vm662_vm3, %v645_v49, 0.0  ;;  %v611_v39 = vadd.f32 %v1357_v0, %v1329_v22  ;;  %v655_v41 = vmax.f32 %v603_v34, 0.0 }
 0x10e   : > { %v688_v50 = vsel %vm662_vm3, %v643_v47, 0.0  ;;  %v1017_v51 = vpop.f32.mrb[16].mxu0  ;;  %v616_v42 = vadd.f32 %v1329_v22, %v1370_v20  ;;  %v656_v3 = vmax.f32 %v608_v36, 0.0  ;;  %v619_v58 = vadd.f32 %v1329_v22, %v1375_v29 }
 0x10f   : > { %v689_v52 = vadd.f32 %v688_v50, %v687_v48  ;;  %v567_v53 = vpop.f32.mrb[17].mxu0  ;;  %v576_v55 = vadd.f32 %v1017_v51, %v1329_v22  ;;  %v657_v46 = vmax.f32 %v611_v39, 0.0  ;;  %v712_v47 = vsel %vm662_vm3, %v655_v41, 0.0 }
 0x110   : > { %v568_v56 = vadd.f32 %v1329_v22, %v567_v53  ;;  %v1018_v57 = vpop.f32.mrb[18].mxu0  ;;  %v658_v48 = vmax.f32 %v616_v42, 0.0  ;;  %v714_v50 = vsel %vm662_vm3, %v656_v3, 0.0  ;;  %v624_v0 = vadd.f32 %v1368_v18, %v1329_v22 }
 0x111   : > { %v691_v59 = vadd.f32 %v690_v54, %v689_v52  ;;  %v570_v61 = vpop.f32.mrb[19].mxu0  ;;  %v579_v2 = vadd.f32 %v1018_v57, %v1329_v22  ;;  %v648_v6 = vmax.f32 %v576_v55, 0.0  ;;  %v716_v52 = vsel %vm662_vm3, %v657_v46, 0.0 }
 0x112   : > { %v646_v1 = vmax.f32 %v568_v56, 0.0  ;;  %v571_v4 = vadd.f32 %v1329_v22, %v570_v61  ;;  %v718_v20 = vsel %vm662_vm3, %v658_v48, 0.0  ;;  %v627_v53 = vadd.f32 %v1373_v26, %v1329_v22 }
 0x113   : > { %v693_v5 = vadd.f32 %v692_v63, %v691_v59  ;;  %v649_v10 = vmax.f32 %v579_v2, 0.0  ;;  %v698_v14 = vsel %vm662_vm3, %v648_v6, 0.0  ;;  %v659_v54 = vmax.f32 %v619_v58, 0.0 }
 0x114   : > { %v694_v7 = vsel %vm662_vm3, %v646_v1, 0.0  ;;  %v647_v8 = vmax.f32 %v571_v4, 0.0  ;;  %v660_v56 = vmax.f32 %v624_v0, 0.0  ;;  %v661_v59 = vmax.f32 %v627_v53, 0.0 }
 0x115   : > { %v695_v9 = vadd.f32 %v694_v7, %v693_v5  ;;  %v700_v19 = vsel %vm662_vm3, %v649_v10, 0.0  ;;  %v720_v29 = vsel %vm662_vm3, %v659_v54, 0.0  ;;  %v1115_v10 = vld [vmem:[%s1499_s5 + $0x8] sm:$0xff]  }
 0x116   : > { %v696_v11 = vsel %vm662_vm3, %v647_v8, 0.0  ;;  %v722_v62 = vsel %vm662_vm3, %v660_v56, 0.0  ;;  %v724_v18 = vsel %vm662_vm3, %v661_v59, 0.0  ;;  %v1114_v8 = vld [vmem:[%s1499_s5] sm:$0xff]  }
 0x117   : > { %v697_v13 = vadd.f32 %v696_v11, %v695_v9  ;;  %v736_v11 = vld [vmem:[%s1498_s4] sm:$0x1] }
 0x119   : > { %v699_v16 = vadd.f32 %v698_v14, %v697_v13 }
 0x11b   : > { %v701_v27 = vadd.f32 %v700_v19, %v699_v16 }
 0x11d   : > { %v703_v28 = vadd.f32 %v702_v23, %v701_v27 }
 0x11f   : > { %v705_v33 = vadd.f32 %v704_v31, %v703_v28 }
 0x121   : > { %v707_v38 = vadd.f32 %v706_v40, %v705_v33 }
 0x123   : > { %v709_v44 = vadd.f32 %v708_v37, %v707_v38 }
 0x125   : > { %v711_v45 = vadd.f32 %v710_v60, %v709_v44 }
 0x127   : > { %v713_v49 = vadd.f32 %v712_v47, %v711_v45 }
 0x129   : > { %v715_v51 = vadd.f32 %v714_v50, %v713_v49 }
 0x12b   : > { %v717_v55 = vadd.f32 %v716_v52, %v715_v51 }
 0x12d   : > { %v719_v57 = vadd.f32 %v718_v20, %v717_v55 }
 0x12f   : > { %v721_v61 = vadd.f32 %v720_v29, %v719_v57 }
 0x131   : > { %v723_v63 = vadd.f32 %v722_v62, %v721_v61 }
 0x133   : > { %v725_v1 = vadd.f32 %v724_v18, %v723_v63 }
 0x135   : > { %v726_v2 = vrot.slane %v725_v1, 4 }
 0x137   : > { %v727_v4 = vadd.f32 %v726_v2, %v725_v1 }
 0x139   : > { %v728_v5 = vrot.slane %v727_v4, 2 }
 0x13b   : > { %v729_v6 = vadd.f32 %v728_v5, %v727_v4 }
 0x13d   : > { %v730_v7 = vrot.slane %v729_v6, 1 }
 0x13f   : > { %v731_v22 = vadd.f32 %v730_v7, %v729_v6 }
 0x141   : > { %v732_v26 = vmul.f32 0.00390625, %v731_v22 }
 0x143   : > { %v733_v9 = vpack.c.bf16 %v732_v26, %v732_v26 }
 0x145   : > { %1034 = vmatmul.mubr.msk.bf16.vlgmr.msra.gmra.mrb[12].mxu1 %vm662_vm3, %v733_v9 }
 0x146   : > { %1038 = vmatpush3.bf16.msra.mxu1 %v1114_v8  ;;  %1041 = vmatprep.mubr.msk.bf16.mxu1 %vm1181_vm2, %v1180_v21 }
 0x147   : > { %1039 = vmatprep.subr.bf16.mxu1 %v1180_v21  ;;  %v792_v21 = vld [vmem:[%s1500_s6] sm:$0x1] }
 0x14a   : > { %1040 = vmatpush3.bf16.msra.mxu1 %v1115_v10 }
 0x218   : > { %v780_v12 = vpop.f32.mrb[12].mxu1 }
 0x219   : > { %v781_v35 = vadd.f32 %v780_v12, %v736_v11  ;;  %v1035_v13 = vpop.f32.mrb[13].mxu1 }
 0x21a   : > { %v783_v14 = vpop.f32.mrb[14].mxu1 }
 0x21b   : > { %v786_v15 = vmax.f32 %v781_v35, 0.0  ;;  %v1036_v16 = vpop.f32.mrb[15].mxu1 }
 0x21d   : > { %v787_v17 = vpack.c.bf16 %v786_v15, %v786_v15 }
 0x21f   : > { %1042 = vmatmul.mubr.msk.bf16.vlgmr.msra.gmra.mrb[16].mxu1 %vm805_vm4, %v787_v17 }
 0x2f2   : > { %v843_v19 = vpop.f32.mrb[16].mxu1 }
 0x2f3   : > { %v844_v23 = vadd.f32 %v843_v19, %v792_v21  ;;  %v1043_v24 = vpop.f32.mrb[17].mxu1 }
 0x2f4   : > { %v846_v25 = vpop.f32.mrb[18].mxu1 }
 0x2f5   : > { %849 = vst [vmem:[%s270_s29] sm:$0x1] %v844_v23  ;;  %v1044_v27 = vpop.f32.mrb[19].mxu1 }
 0x2f6   : > { %1129 = shalt.err (!%p1126_p3)
}
 0x2f7   : > { %s1130_s19 = scalar_lea.hbm %s1452_s14, 16  ;;  %s1134_s22 = scalar_lea.hbm %s1501_s7, 32 }
 0x2f8   : > { %p1131_p4 = scmp.ne.s32.totalorder %s1452_s14, %s1130_s19  ;;  %p1135_p9 = scmp.lt.u32.totalorder %s1452_s14, %s1501_s7 }
 0x2f9   : > { %p1136_p10 = scmp.lt.u32.totalorder %s1134_s22, %s1130_s19  ;;  %p1138_p12 = scmp.lt.u32.totalorder %s1130_s19, %s1452_s14 }
 0x2fa   : > { %p1132_p7 = pnand %p1131_p4, %p1261_p5 }
 0x2fb   : > { %p1137_p11 = por %p1136_p10, %p1135_p9 }
 0x2fc   : > { %p1133_p8 = pneg %p1132_p7 }
 0x2fd   : > { %p1139_p13 = por %p1138_p12, %p1137_p11 }
 0x2ff   : > { %p1140_p0 = pnand %p1139_p13, %p1133_p8 }
 0x301   : > { %1143 = shalt.err (!%p1140_p0)
}
 0x302   : > { %1053 = dma.vmem_to_hbm [thread:$0]  (%p1261_p5), %s1454_s8, 16, %s1452_s14, %s851_s15  }
 0x303 PF: > { %p1059_p1 = scmp.ge.s32.totalorder %s1178_s27, 2  ;;  %s875_s9 = sand.u32 1, %s1166_s24  }
 0x304   : > { %s876_s13 = scalar_lea.sflag [#allocation3], %s875_s9 }
 0x305   : > { %p1056_p2 = pnand %p1059_p1, %p1265_p6 }
 0x307   : > { %1161 = dma.done.wait (!%p1056_p2), %s876_s13, 16  }
 0x308   : > { %1163 = vsyncadd (!%p1056_p2), %s876_s13, 4294967280  ;;  %p17_p3 = scmp.ge.s32.totalorder %s1248_s30, 4   ;;  %s1504_s24 = smov %s1170_s25 }
 0x309   : > { %s1505_s25 = smov %s1174_s26  ;;  %s1506_s26 = smov %s1259_s10 }
 0x30a   : > { %s1507_s27 = smov %s1248_s30  ;;  %19 = sbr.rel (!%p17_p3) target bundleno = 3 (0x3), region = 83 }
 0x311   :  { %880 = vsyncpa [#allocation3], 1 }
 0x312   :  { %882 = vsyncpa [#allocation3 + $0x1], 1 }

</bundles_post_ra>
